<compile_context>
chip_gen: v6e
topology: v6e:2x2x1
jax: 0.10.0
libtpu: 0.0.40
codegen_flags: <defaults>
</compile_context>

<pallas_src>
import math

import jax
import jax.numpy as jnp
from jax.experimental import pallas as pl
from jax.experimental.pallas import tpu as pltpu


def _round_up(x, m):
    return ((x + m - 1) // m) * m


def _pad2d(a, rows, cols):
    r, c = a.shape
    if r == rows and c == cols:
        return a
    return jnp.pad(a, ((0, rows - r), (0, cols - c)))


def _choose_tile(n, cap):
    """Largest multiple of 128 that divides n and is <= cap (requires n%128==0)."""
    cap = min(cap, n)
    best = 128
    for t in range(128, cap + 1, 128):
        if n % t == 0:
            best = t
    return best


def _vmem_limit_bytes(footprint):
    try:
        cap = pltpu.get_tpu_info().vmem_capacity_bytes
    except Exception:                      # pragma: no cover - defensive fallback
        cap = 64 * 1024 * 1024             # v7x lower bound
    ceiling = (cap * 3) // 4               # ~48 MiB on v7x, ~96 MiB on v5e/v6e
    return int(min(max(2 * footprint, 32 * 1024 * 1024), ceiling))


# ---------------------------------------------------------------------------
# Kernel 1: row-tiled feature transform   s = (x @ W)  (cast to agg dtype)
# ---------------------------------------------------------------------------
def _feature_transform_kernel(x_ref, w_ref, s_ref):
    s_ref[...] = jnp.dot(
        x_ref[...], w_ref[...], preferred_element_type=jnp.float32
    ).astype(s_ref.dtype)


def _feature_transform(x, w, *, tm, out_dtype):
    n, f = x.shape
    h = w.shape[1]
    return pl.pallas_call(
        _feature_transform_kernel,
        out_shape=jax.ShapeDtypeStruct((n, h), out_dtype),
        grid=(n // tm,),
        in_specs=[
            pl.BlockSpec((tm, f), lambda i: (i, 0)),   # row tile of x / h1
            pl.BlockSpec((f, h), lambda i: (0, 0)),    # full (small) weight
        ],
        out_specs=pl.BlockSpec((tm, h), lambda i: (i, 0)),
        compiler_params=pltpu.CompilerParams(
            dimension_semantics=("parallel",)),
    )(x, w)


# ---------------------------------------------------------------------------
# Kernel 2: tiled aggregation   out = relu(row_scale * (A @ s) + b)
# ---------------------------------------------------------------------------
def _make_aggregate_kernel(tk, s_resident, use_acc_scratch):
    off_hint = 128 if tk % 128 == 0 else 8

    def _body(adj_ref, s_ref, scale_ref, b_ref, out_ref, acc_ref):
        # Accumulate directly into the (resident, f32) output block when we
        # can; fall back to an f32 scratch when the output dtype is narrower.
        acc = out_ref if acc_ref is None else acc_ref
        k = pl.program_id(1)

        @pl.when(k == 0)
        def _init():
            acc[...] = jnp.zeros_like(acc)

        if s_resident:
            start = pl.multiple_of(k * tk, off_hint)
            s_blk = s_ref[pl.ds(start, tk), :]      # slice the resident operand
        else:
            s_blk = s_ref[...]

        a = adj_ref[...]
        if a.dtype != s_blk.dtype:
            # int8 binary adjacency -> bf16 on the VPU (kernel is DMA-bound).
            a = a.astype(jnp.float32).astype(s_blk.dtype)

        acc[...] += jnp.dot(a, s_blk, preferred_element_type=jnp.float32)

        @pl.when(k == pl.num_programs(1) - 1)
        def _finalize():
            y = acc[...] * scale_ref[...] + b_ref[...]
            out_ref[...] = jnp.maximum(y, 0.0).astype(out_ref.dtype)

    if use_acc_scratch:
        def kernel(adj_ref, s_ref, scale_ref, b_ref, out_ref, acc_ref):
            _body(adj_ref, s_ref, scale_ref, b_ref, out_ref, acc_ref)
    else:
        def kernel(adj_ref, s_ref, scale_ref, b_ref, out_ref):
            _body(adj_ref, s_ref, scale_ref, b_ref, out_ref, None)
    return kernel


def _aggregate(a_mat, s, row_scale, b, *, tm, tk, out_dtype, s_resident):
    n = a_mat.shape[0]
    h = s.shape[1]
    use_acc_scratch = jnp.dtype(out_dtype) != jnp.dtype(jnp.float32)

    if s_resident:
        s_spec = pl.BlockSpec((n, h), lambda i, k: (0, 0))   # DMA'd once, resident
    else:
        s_spec = pl.BlockSpec((tk, h), lambda i, k: (k, 0))  # streamed per k step

    # Conservative VMEM footprint (double-buffer inputs/outputs).
    adj_b = 2 * tm * tk * a_mat.dtype.itemsize
    s_b = 2 * (n if s_resident else tk) * h * s.dtype.itemsize
    out_b = 2 * tm * h * jnp.dtype(out_dtype).itemsize
    acc_b = tm * h * 4 if use_acc_scratch else 0
    footprint = adj_b + s_b + out_b + acc_b + 8 * (tm + h)

    return pl.pallas_call(
        _make_aggregate_kernel(tk, s_resident, use_acc_scratch),
        out_shape=jax.ShapeDtypeStruct((n, h), out_dtype),
        grid=(n // tm, n // tk),
        in_specs=[
            pl.BlockSpec((tm, tk), lambda i, k: (i, k)),   # adjacency tile
            s_spec,                                        # transformed features
            pl.BlockSpec((tm, 1), lambda i, k: (i, 0)),    # per-row 1/deg scale
            pl.BlockSpec((1, h), lambda i, k: (0, 0)),     # bias (resident)
        ],
        out_specs=pl.BlockSpec((tm, h), lambda i, k: (i, 0)),
        scratch_shapes=(
            [pltpu.VMEM((tm, h), jnp.float32)] if use_acc_scratch else []),
        compiler_params=pltpu.CompilerParams(
            dimension_semantics=("parallel", "arbitrary"),
            vmem_limit_bytes=_vmem_limit_bytes(footprint),
        ),
    )(a_mat, s, row_scale, b)


# ---------------------------------------------------------------------------
# Full GCN forward
# ---------------------------------------------------------------------------
def gcn_forward(x, adj, params, *, tile=2048, adj_mode="int8",
                agg_dtype=jnp.bfloat16, s_resident=None):
    """x: (N, F) f32 features; adj: (N, N) f32 dense normalized adjacency.

    adj_mode:
      "int8": factor adj = diag(row_scale) @ A with A stored int8.  Bit-exact
              (and half the HBM bytes of bf16) when each row's nonzeros are
              small integer multiples of the row's smallest nonzero entry —
              true for the standard row-normalized binary adjacency D^-1(A+I).
      "bf16": general fallback; adjacency cast to bf16 (~1e-2 rel error).

    Returns dict(score=(N, 1) f32, emb=(N, H) f32).
    """
    N, F = x.shape
    H = params["w1"].shape[1]

    Hp = _round_up(H, 128)     # lane-dense hidden dim -> unmasked full-width vst
    Fp = _round_up(F, 8)

    if N <= 128:
        Np = _round_up(max(N, 8), 8)
        TM = TK = Np                            # single full-extent block
    else:
        Np = _round_up(N, 128)                  # pad granularity != tile size
        TK = _choose_tile(Np, tile)             # big K tile amortizes step cost
        # >= 2 (>= 4 for large graphs) row tiles so the "parallel" row axis can
        # span both TensorCores on v7x.
        min_row_tiles = 2 if Np < 2048 else 4
        TM = _choose_tile(Np, min(tile, max(128, Np // min_row_tiles)))

    if s_resident is None:
        # Hold the (Np, Hp) transformed features fully VMEM-resident unless
        # they would eat too much of the VMEM budget (64 MiB/core on v7x).
        s_resident = Np * Hp * jnp.dtype(agg_dtype).itemsize <= 12 * 1024 * 1024

    x_p = _pad2d(x.astype(jnp.float32), Np, Fp)
    adj_p = _pad2d(adj.astype(jnp.float32), Np, Np)

    if adj_mode == "int8":
        # adj = diag(row_scale) @ A with A small nonneg integers (exact).
        nz_min = jnp.min(jnp.where(adj_p > 0, adj_p, jnp.inf), axis=1,
                         keepdims=True)
        row_scale = jnp.where(jnp.isfinite(nz_min), nz_min, 1.0)
        a_mat = jnp.round(adj_p / row_scale).astype(jnp.int8)
        row_scale = row_scale.astype(jnp.float32)
    else:
        a_mat = adj_p.astype(agg_dtype)
        row_scale = jnp.ones((Np, 1), jnp.float32)

    w1_p = _pad2d(params["w1"].astype(jnp.float32), Fp, Hp)
    b1_p = _pad2d(params["b1"].reshape(1, -1).astype(jnp.float32), 1, Hp)
    w2_p = _pad2d(params["w2"], Hp, Hp).astype(agg_dtype)
    b2_p = _pad2d(params["b2"].reshape(1, -1).astype(jnp.float32), 1, Hp)

    # --- layer 1: h1 = relu(adj @ (x @ W1) + b1) ---
    s1 = _feature_transform(x_p, w1_p, tm=TM, out_dtype=agg_dtype)
    # h1 is an internal activation: emit it in bf16 (halves its HBM round trip;
    # the layer-2 feature transform consumes it in bf16 anyway).
    h1 = _aggregate(a_mat, s1, row_scale, b1_p, tm=TM, tk=TK,
                    out_dtype=agg_dtype, s_resident=s_resident)

    # TODO(synk): F.dropout(p=0.5) is identity in eval mode; training-mode RNG
    # dropout could be fused here with pltpu.prng_seed / pltpu.stateful_bernoulli.

    # NOTE: padded rows of h1 equal relu(b1) (nonzero), but they are only ever
    # multiplied by the zero-padded adjacency *columns* in layer 2 and sliced
    # off at the end, so results are unaffected.  Keep this invariant.

    # --- layer 2: emb = relu(adj @ (h1 @ W2) + b2) ---
    s2 = _feature_transform(h1, w2_p, tm=TM, out_dtype=agg_dtype)
    emb_p = _aggregate(a_mat, s2, row_scale, b2_p, tm=TM, tk=TK,
                       out_dtype=jnp.float32, s_resident=s_resident)

    emb = emb_p[:N, :H]

    # --- fc3: Linear(H -> 1). A width-1 output would force lane-sparse masked
    # stores inside a kernel, so this negligible matvec runs in plain XLA.
    score = emb @ params["w3"] + params["b3"]

    # TODO(synk): for genuinely sparse graphs, skip empty adjacency tiles via a
    # PrefetchScalarGridSpec data-dependent index_map over nonzero k-blocks.

    return {"score": score, "emb": emb}


def init_params(key, nfeat, nhid):
    """Deterministic init mirroring GraphConvolution.reset_parameters / nn.Linear."""
    ks = jax.random.split(key, 6)
    stdv1 = 1.0 / math.sqrt(nhid)
    stdv2 = 1.0 / math.sqrt(nhid)
    stdv3 = 1.0 / math.sqrt(nhid)   # fc3 fan_in = nhid
    u = lambda k, shape, s: jax.random.uniform(k, shape, jnp.float32, -s, s)
    return {
        "w1": u(ks[0], (nfeat, nhid), stdv1),
        "b1": u(ks[1], (1, nhid), stdv1),
        "w2": u(ks[2], (nhid, nhid), stdv2),
        "b2": u(ks[3], (1, nhid), stdv2),
        "w3": u(ks[4], (nhid, 1), stdv3),
        "b3": u(ks[5], (1, 1), stdv3),
    }


def _reference_forward(x, adj, params):
    h1 = jnp.maximum(adj @ (x @ params["w1"]) + params["b1"], 0.0)
    h2 = jnp.maximum(adj @ (h1 @ params["w2"]) + params["b2"], 0.0)
    score = h2 @ params["w3"] + params["b3"]
    return score, h2


if __name__ == "__main__":
    key = jax.random.PRNGKey(0)
    nfeat, nhid = 8, 32
    k_in1, k_in2, k_p = jax.random.split(key, 3)
    params = init_params(k_p, nfeat, nhid)

    def make_inputs(k, n):
        k_x, k_a = jax.random.split(k)
        xx = jax.random.normal(k_x, (n, nfeat), jnp.float32)
        a = (jax.random.uniform(k_a, (n, n)) < 0.3).astype(jnp.float32)
        a = a * (1.0 - jnp.eye(n, dtype=jnp.float32))          # no self loops
        aa = jnp.maximum(a, a.T) + jnp.eye(n, dtype=jnp.float32)
        aa = aa / jnp.sum(aa, axis=1, keepdims=True)           # D^-1 (A + I)
        return xx, aa

    def check(out, xx, aa, n):
        assert out["score"].shape == (n, 1)
        assert out["emb"].shape == (n, nhid)
        ref_score, ref_emb = _reference_forward(xx, aa, params)
        assert jnp.allclose(out["emb"], ref_emb, atol=2e-2, rtol=2e-2)
        assert jnp.allclose(out["score"], ref_score, atol=2e-2, rtol=2e-2)

    # Case 1: small graph (single full-extent block, int8 adjacency path).
    x1, adj1 = make_inputs(k_in1, 16)
    out1 = gcn_forward(x1, adj1, params)
    jax.block_until_ready(out1)
    check(out1, x1, adj1, 16)

    # Case 2: larger graph; tile=128 forces a (2, 2) grid so the K-axis
    # accumulation + resident-s pl.ds slicing path is exercised.
    x2, adj2 = make_inputs(k_in2, 256)
    out2 = gcn_forward(x2, adj2, params, tile=128)
    jax.block_until_ready(out2)
    check(out2, x2, adj2, 256)

    # Case 3: bf16-adjacency fallback + streamed (non-resident) s path.
    out3 = gcn_forward(x2, adj2, params, tile=128, adj_mode="bf16",
                       s_resident=False)
    jax.block_until_ready(out3)
    check(out3, x2, adj2, 256)

    print("KERNEL_OK")
</pallas_src>

<mosaic_0001>
module attributes {stable_mosaic.version = 11 : i64} {
  func.func @_feature_transform_kernel(%arg0: i32, %arg1: memref<16x8xf32, #tpu.memory_space<vmem>>, %arg2: memref<8x128xf32, #tpu.memory_space<vmem>>, %arg3: memref<16x128xbf16, #tpu.memory_space<vmem>>) attributes {dimension_semantics = [#tpu.dimension_semantics<parallel>], iteration_bounds = array<i64: 1>, scalar_prefetch = 0 : i64, scratch_operands = 0 : i64, tpu.core_type = #tpu.core_type<tc>, window_params = [{transform_indices = @transform_0, window_bounds = array<i64: 16, 8>}, {pipeline_mode = #tpu.pipeline_mode<synchronous>, transform_indices = @transform_1, window_bounds = array<i64: 8, 128>}, {transform_indices = @transform_2, window_bounds = array<i64: 16, 128>}]} {
    %c0 = arith.constant 0 : index
    %c0_0 = arith.constant 0 : index
    %0 = vector.load %arg1[%c0, %c0_0] : memref<16x8xf32, #tpu.memory_space<vmem>>, vector<16x8xf32>
    %c0_1 = arith.constant 0 : index
    %c0_2 = arith.constant 0 : index
    %1 = vector.load %arg2[%c0_1, %c0_2] : memref<8x128xf32, #tpu.memory_space<vmem>>, vector<8x128xf32>
    %cst = arith.constant dense<0.000000e+00> : vector<16x128xf32>
    %2 = tpu.matmul %0, %1, %cst {dimension_numbers = #tpu.dot_dimension_numbers<[1], [0], [0], [1], [0, 0, 1, 1], [], []>} : vector<16x8xf32>, vector<8x128xf32>, vector<16x128xf32> -> vector<16x128xf32>
    %3 = arith.truncf %2 : vector<16x128xf32> to vector<16x128xbf16>
    %c0_3 = arith.constant 0 : index
    %c0_4 = arith.constant 0 : index
    %4 = vector.load %arg3[%c0_3, %c0_4] : memref<16x128xbf16, #tpu.memory_space<vmem>>, vector<16x128xbf16>
    tpu.vector_store %arg3[%c0_3, %c0_4], %3 {strides = array<i32>} : memref<16x128xbf16, #tpu.memory_space<vmem>>, vector<16x128xbf16>,
    return
  }
  func.func @transform_0(%arg0: i32) -> (i32, i32) {
    %c0_i32 = arith.constant 0 : i32
    %c0_i32_0 = arith.constant 0 : i32
    return %arg0, %c0_i32 : i32, i32
  }
  func.func @transform_1(%arg0: i32) -> (i32, i32) {
    %c0_i32 = arith.constant 0 : i32
    %c0_i32_0 = arith.constant 0 : i32
    %c0_i32_1 = arith.constant 0 : i32
    return %c0_i32, %c0_i32_0 : i32, i32
  }
  func.func @transform_2(%arg0: i32) -> (i32, i32) {
    %c0_i32 = arith.constant 0 : i32
    %c0_i32_0 = arith.constant 0 : i32
    return %arg0, %c0_i32 : i32, i32
  }
}

</mosaic_0001>

<bundles_post_ra>
// kernel: tpu_custom_call.1
= control target key start
LH: loop header
LB: loop body
LE: loop exit
PB: predicated region body
PF: predicated region fallthrough
CT: control target
= control target key end

     0   :  { %vm15_vm0 = vcmask 64512   ;;  %s197_s0 = inlined_call_operand.vmem [shape: f32[16,8], index: 0, kind: input, shape index: {}]   ;;  %s198_s1 = inlined_call_operand.vmem [shape: f32[8,128], index: 1, kind: input, shape index: {}]   ;;  %s199_s2 = inlined_call_operand.hbm [shape: bf16[16,128], index: 2, kind: output, shape index: {}]  }
   0x1   :  { %v14_v0 = vld [vmem:[%s198_s1] sm:$0xff]  ;;  %v13_v2 = vld [vmem:[%s197_s0 + $0x8] sm:$0xff] }
   0x2   :  { %v12_v1 = vld [vmem:[%s197_s0] sm:$0xff]  ;;  %137 = vmatprep.subr.mxu0 %v14_v0 }
   0x3   :  { %139 = vmatprep.mubr.msk.f32.mxu0 %vm15_vm0, %v12_v1 }
   0x4   :  { %7 = vsyncpa [#allocation3], 0  ;;  %138 = vmatpush3.msra.mxu0 %v14_v0  ;;  %s167_s15 = smov [#allocation2]  }
   0x5   :  { %140 = vmatmul.mubr.msk.f32.vlgmr.msra.gmra.mxu0 %vm15_vm0, %v13_v2  ;;  %s112_s16 = sshll.u32 %s167_s15, 4  ;;  %s113_s16 = int_to_ptr.vmem [resolvable:$true] %s112_s16 }
   0x6   :  { %s145_s1 = scalar_lea.vmem %s113_s16, 128  ;;  %p150_p1 = scmp.lt.s32.totalorder %s113_s16, %s113_s16 }
   0x7   :  { %p146_p0 = scmp.ne.s32.totalorder %s113_s16, %s145_s1  ;;  %p151_p2 = scmp.lt.s32.totalorder %s145_s1, %s145_s1 }
   0x9   :  { %p152_p3 = por %p151_p2, %p150_p1 }
   0xb   :  { %p153_p4 = pnand %p152_p3, %p146_p0 }
  0xc5   :  { %v141_v3 = vpop.f32.mrf.mxu0 }
  0xc7   :  { %v88_v4 = vpop.f32.mrf.mxu0 }
  0xc8   :  { %v132_v5 = vpack.c.bf16 %v141_v3, %v88_v4 }
  0xca   :  { %133 = vst [vmem:[#allocation2] sm:$0xff] %v132_v5  }
  0xcb   :  { %156 = shalt.err (!%p153_p4)
}
  0xcc   :  { %s168_s0 = smov 64   ;;  %s169_s17 = smov 4  }
  0xcd   :  { %118 = dma.vmem_to_hbm [thread:$0]  %s113_s16, 128, %s199_s2, [#allocation3], %s168_s0, %s168_s0, %s169_s17  }
  0xce   :  { %165 = dma.done.wait [#allocation3], 128  }
  0xcf   :  { %166 = vsyncadd [#allocation3], 4294967168 }
  0xd0   :  { %122 = vsyncpa [#allocation3], 1 }

</bundles_post_ra>
